<compile_context>
chip_gen: v5e
topology: v5e:2x2
jax: 0.10.0
libtpu: 0.0.40
codegen_flags: <defaults>
</compile_context>

<pallas_src>
import functools

import jax
import jax.numpy as jnp
import numpy as np
from jax.experimental import pallas as pl
from jax.experimental.pallas import tpu as pltpu


def _pad_rows(x, multiple):
    """Zero-pad the leading (batch) dim up to a multiple of `multiple`."""
    pad = (-x.shape[0]) % multiple
    if pad:
        x = jnp.pad(x, ((0, pad), (0, 0)))
    return x


# ----------------------------------------------------------------------------
# Kernel 1: sentence-pair classification head (get_sentence_embedding path).
# ----------------------------------------------------------------------------
def _make_pair_kernel(use_rep: bool, use_diff: bool, use_mult: bool):
    """Build the pair-head kernel for a static concatenation_args configuration."""

    def kernel(rep_a_ref, rep_b_ref, w_ref, bias_ref, out_ref):
        a = rep_a_ref[...]
        b = rep_b_ref[...]
        terms = []
        if use_rep:
            terms.append(a)
            terms.append(b)
        if use_diff:
            terms.append(jnp.abs(a - b))
        if use_mult:
            terms.append(a * b)
        # Accumulate T matmuls in f32 on the MXU; w_ref[t] is a free leading-axis view.
        acc = jnp.dot(terms[0], w_ref[0], preferred_element_type=jnp.float32)
        for t in range(1, len(terms)):
            acc = acc + jnp.dot(terms[t], w_ref[t], preferred_element_type=jnp.float32)
        out_ref[...] = (acc + bias_ref[...]).astype(out_ref.dtype)

    return kernel


def pair_head(rep_a, rep_b, w_pair, b_pair, *,
              concat_rep=True, concat_diff=True, concat_mult=False,
              compute_dtype=None, block_b=512):
    """rep_a, rep_b: [B, H]; w_pair: [T*H, C]; b_pair: [1, C] -> logits [B, C]."""
    B, H = rep_a.shape
    C = w_pair.shape[1]
    out_dtype = rep_a.dtype

    num_terms = (2 if concat_rep else 0) + (1 if concat_diff else 0) + (1 if concat_mult else 0)
    assert num_terms >= 1, "at least one concatenation term required"
    assert w_pair.shape[0] == num_terms * H, (w_pair.shape, num_terms, H)

    if compute_dtype is not None:  # e.g. jnp.bfloat16: halves HBM bytes; f32 accum kept
        rep_a = rep_a.astype(compute_dtype)
        rep_b = rep_b.astype(compute_dtype)
        w_pair = w_pair.astype(compute_dtype)
    wT = w_pair.reshape(num_terms, H, C)     # leading-axis indexing in kernel = free view
    bias = b_pair.astype(jnp.float32)        # bias added in f32 against the f32 accumulator

    if B <= block_b:
        tb = B                               # single block == full dim (tiling rule satisfied)
    else:
        assert block_b % 16 == 0, "block_b must be a multiple of 16 (f32/bf16 sublanes)"
        tb = block_b
        rep_a = _pad_rows(rep_a, tb)
        rep_b = _pad_rows(rep_b, tb)
    Bp = rep_a.shape[0]

    act_bytes = jnp.dtype(rep_a.dtype).itemsize
    cost = pl.CostEstimate(
        flops=2 * B * num_terms * H * C,
        transcendentals=0,
        bytes_accessed=2 * B * H * act_bytes + num_terms * H * C * act_bytes
        + B * C * jnp.dtype(out_dtype).itemsize + C * 4,
    )

    kernel = _make_pair_kernel(concat_rep, concat_diff, concat_mult)
    out = pl.pallas_call(
        kernel,
        out_shape=jax.ShapeDtypeStruct((Bp, C), out_dtype),
        grid=(Bp // tb,),
        in_specs=[
            pl.BlockSpec((tb, H), lambda i: (i, 0)),               # streamed batch tiles
            pl.BlockSpec((tb, H), lambda i: (i, 0)),
            pl.BlockSpec((num_terms, H, C), lambda i: (0, 0, 0)),  # weight resident across grid
            pl.BlockSpec((1, C), lambda i: (0, 0)),                # bias resident across grid
        ],
        out_specs=pl.BlockSpec((tb, C), lambda i: (i, 0)),
        compiler_params=pltpu.CompilerParams(dimension_semantics=("parallel",)),
        cost_estimate=cost,
    )(rep_a, rep_b, wT, bias)
    return out[:B]


# ----------------------------------------------------------------------------
# Kernel 2: single-sentence logits path (forward without labels): fc(dropout(x)).
# Dropout is identity in eval mode (reproduced here).
# TODO(synk): training-mode dropout (p=0.1) would use pltpu.prng_seed /
#             pltpu.prng_random_bits; the reference forward is evaluated here
#             with eval semantics.
# ----------------------------------------------------------------------------
def _fc_kernel(x_ref, w_ref, bias_ref, out_ref):
    acc = jnp.dot(x_ref[...], w_ref[...], preferred_element_type=jnp.float32)
    out_ref[...] = (acc + bias_ref[...]).astype(out_ref.dtype)


def fc_head(x, w_fc, b_fc, *, compute_dtype=None, block_b=512):
    """x: [B, H]; w_fc: [H, C]; b_fc: [1, C] -> logits [B, C]."""
    B, H = x.shape
    C = w_fc.shape[1]
    out_dtype = x.dtype

    if compute_dtype is not None:
        x = x.astype(compute_dtype)
        w_fc = w_fc.astype(compute_dtype)
    bias = b_fc.astype(jnp.float32)

    if B <= block_b:
        tb = B
    else:
        assert block_b % 16 == 0
        tb = block_b
        x = _pad_rows(x, tb)
    Bp = x.shape[0]

    act_bytes = jnp.dtype(x.dtype).itemsize
    cost = pl.CostEstimate(
        flops=2 * B * H * C,
        transcendentals=0,
        bytes_accessed=B * H * act_bytes + H * C * act_bytes
        + B * C * jnp.dtype(out_dtype).itemsize + C * 4,
    )

    out = pl.pallas_call(
        _fc_kernel,
        out_shape=jax.ShapeDtypeStruct((Bp, C), out_dtype),
        grid=(Bp // tb,),
        in_specs=[
            pl.BlockSpec((tb, H), lambda i: (i, 0)),
            pl.BlockSpec((H, C), lambda i: (0, 0)),
            pl.BlockSpec((1, C), lambda i: (0, 0)),
        ],
        out_specs=pl.BlockSpec((tb, C), lambda i: (i, 0)),
        compiler_params=pltpu.CompilerParams(dimension_semantics=("parallel",)),
        cost_estimate=cost,
    )(x, w_fc, bias)
    return out[:B]


# ----------------------------------------------------------------------------
# Pure-JAX references (mirror the PyTorch module math).
# ----------------------------------------------------------------------------
def pair_head_ref(rep_a, rep_b, w_pair, b_pair, *,
                  concat_rep=True, concat_diff=True, concat_mult=False):
    feats = []
    if concat_rep:
        feats += [rep_a, rep_b]
    if concat_diff:
        feats.append(jnp.abs(rep_a - rep_b))
    if concat_mult:
        feats.append(rep_a * rep_b)
    return jnp.concatenate(feats, axis=1) @ w_pair + b_pair


def fc_head_ref(x, w_fc, b_fc):
    return x @ w_fc + b_fc


if __name__ == "__main__":
    key = jax.random.PRNGKey(0)
    k_a, k_b, k_wp, k_bp, k_wf, k_bf, k_wm = jax.random.split(key, 7)

    B = 2           # batch (sentence pairs)
    H = 32          # hidden_size of the (synthetic) BERT encoder
    C = 3           # num_classes
    NUM_CONCAT = 3  # default concatenation_args -> rep_a, rep_b, |rep_a - rep_b|

    # Synthetic sentence embeddings standing in for SentenceTransformer outputs.
    rep_a = jax.random.normal(k_a, (B, H), dtype=jnp.float32)
    rep_b = jax.random.normal(k_b, (B, H), dtype=jnp.float32)

    # Classifier parameters, stored pre-transposed vs PyTorch nn.Linear ([in, out]).
    w_pair = jax.random.normal(k_wp, (NUM_CONCAT * H, C), dtype=jnp.float32) * 0.02
    b_pair = jax.random.normal(k_bp, (1, C), dtype=jnp.float32) * 0.02
    w_fc = jax.random.normal(k_wf, (H, C), dtype=jnp.float32) * 0.02
    b_fc = jax.random.normal(k_bf, (1, C), dtype=jnp.float32) * 0.02

    # --- get_sentence_embedding path (labels branch), f32 compute -------------
    logits_pair = jax.block_until_ready(pair_head(rep_a, rep_b, w_pair, b_pair))
    ref_pair = pair_head_ref(rep_a, rep_b, w_pair, b_pair)
    np.testing.assert_allclose(np.asarray(logits_pair), np.asarray(ref_pair),
                               rtol=1e-5, atol=1e-5)

    # --- same path, bf16 activations/weights (halved HBM traffic) -------------
    logits_pair_bf16 = jax.block_until_ready(
        pair_head(rep_a, rep_b, w_pair, b_pair, compute_dtype=jnp.bfloat16))
    np.testing.assert_allclose(np.asarray(logits_pair_bf16), np.asarray(ref_pair),
                               rtol=2e-2, atol=2e-2)

    # --- non-default concatenation_args: rep + diff + multiplication ----------
    w_pair4 = jax.random.normal(k_wm, (4 * H, C), dtype=jnp.float32) * 0.02
    logits_pair4 = jax.block_until_ready(
        pair_head(rep_a, rep_b, w_pair4, b_pair, concat_mult=True))
    ref_pair4 = pair_head_ref(rep_a, rep_b, w_pair4, b_pair, concat_mult=True)
    np.testing.assert_allclose(np.asarray(logits_pair4), np.asarray(ref_pair4),
                               rtol=1e-5, atol=1e-5)

    # --- forward (no-labels) logits path: fc(dropout(x)), eval mode -----------
    logits_fc = jax.block_until_ready(fc_head(rep_a, w_fc, b_fc))
    ref_fc = fc_head_ref(rep_a, w_fc, b_fc)
    np.testing.assert_allclose(np.asarray(logits_fc), np.asarray(ref_fc),
                               rtol=1e-5, atol=1e-5)

    # --- exercise the tiled/padded grid path (still tiny; 16-row blocks) ------
    Bt = 20
    ra_t = jax.random.normal(jax.random.PRNGKey(1), (Bt, H), dtype=jnp.float32)
    rb_t = jax.random.normal(jax.random.PRNGKey(2), (Bt, H), dtype=jnp.float32)
    logits_t = jax.block_until_ready(pair_head(ra_t, rb_t, w_pair, b_pair, block_b=16))
    np.testing.assert_allclose(np.asarray(logits_t),
                               np.asarray(pair_head_ref(ra_t, rb_t, w_pair, b_pair)),
                               rtol=1e-5, atol=1e-5)

    print("KERNEL_OK")
</pallas_src>

<mosaic_0001>
module attributes {stable_mosaic.version = 11 : i64} {
  func.func @kernel(%arg0: i32, %arg1: memref<2x32xf32, #tpu.memory_space<vmem>>, %arg2: memref<2x32xf32, #tpu.memory_space<vmem>>, %arg3: memref<3x32x3xf32, #tpu.memory_space<vmem>>, %arg4: memref<1x3xf32, #tpu.memory_space<vmem>>, %arg5: memref<2x3xf32, #tpu.memory_space<vmem>>) attributes {dimension_semantics = [#tpu.dimension_semantics<parallel>], iteration_bounds = array<i64: 1>, scalar_prefetch = 0 : i64, scratch_operands = 0 : i64, tpu.core_type = #tpu.core_type<tc>, window_params = [{transform_indices = @transform_0, window_bounds = array<i64: 2, 32>}, {transform_indices = @transform_1, window_bounds = array<i64: 2, 32>}, {pipeline_mode = #tpu.pipeline_mode<synchronous>, transform_indices = @transform_2, window_bounds = array<i64: 3, 32, 3>}, {pipeline_mode = #tpu.pipeline_mode<synchronous>, transform_indices = @transform_3, window_bounds = array<i64: 1, 3>}, {transform_indices = @transform_4, window_bounds = array<i64: 2, 3>}]} {
    %c0 = arith.constant 0 : index
    %c0_0 = arith.constant 0 : index
    %0 = vector.load %arg1[%c0, %c0_0] : memref<2x32xf32, #tpu.memory_space<vmem>>, vector<2x32xf32>
    %c0_1 = arith.constant 0 : index
    %c0_2 = arith.constant 0 : index
    %1 = vector.load %arg2[%c0_1, %c0_2] : memref<2x32xf32, #tpu.memory_space<vmem>>, vector<2x32xf32>
    %2 = arith.subf %0, %1 : vector<2x32xf32>
    %3 = math.absf %2 : vector<2x32xf32>
    %c0_3 = arith.constant 0 : index
    %c0_4 = arith.constant 0 : index
    %c0_5 = arith.constant 0 : index
    %4 = vector.load %arg3[%c0_3, %c0_4, %c0_5] : memref<3x32x3xf32, #tpu.memory_space<vmem>>, vector<1x32x3xf32>
    %5 = vector.shape_cast %4 : vector<1x32x3xf32> to vector<32x3xf32>
    %cst = arith.constant dense<0.000000e+00> : vector<2x3xf32>
    %6 = tpu.matmul %0, %5, %cst {dimension_numbers = #tpu.dot_dimension_numbers<[1], [0], [0], [1], [0, 0, 1, 1], [], []>} : vector<2x32xf32>, vector<32x3xf32>, vector<2x3xf32> -> vector<2x3xf32>
    %c1 = arith.constant 1 : index
    %c0_6 = arith.constant 0 : index
    %c0_7 = arith.constant 0 : index
    %7 = vector.load %arg3[%c1, %c0_6, %c0_7] : memref<3x32x3xf32, #tpu.memory_space<vmem>>, vector<1x32x3xf32>
    %8 = vector.shape_cast %7 : vector<1x32x3xf32> to vector<32x3xf32>
    %cst_8 = arith.constant dense<0.000000e+00> : vector<2x3xf32>
    %9 = tpu.matmul %1, %8, %cst_8 {dimension_numbers = #tpu.dot_dimension_numbers<[1], [0], [0], [1], [0, 0, 1, 1], [], []>} : vector<2x32xf32>, vector<32x3xf32>, vector<2x3xf32> -> vector<2x3xf32>
    %10 = arith.addf %6, %9 : vector<2x3xf32>
    %c2 = arith.constant 2 : index
    %c0_9 = arith.constant 0 : index
    %c0_10 = arith.constant 0 : index
    %11 = vector.load %arg3[%c2, %c0_9, %c0_10] : memref<3x32x3xf32, #tpu.memory_space<vmem>>, vector<1x32x3xf32>
    %12 = vector.shape_cast %11 : vector<1x32x3xf32> to vector<32x3xf32>
    %cst_11 = arith.constant dense<0.000000e+00> : vector<2x3xf32>
    %13 = tpu.matmul %3, %12, %cst_11 {dimension_numbers = #tpu.dot_dimension_numbers<[1], [0], [0], [1], [0, 0, 1, 1], [], []>} : vector<2x32xf32>, vector<32x3xf32>, vector<2x3xf32> -> vector<2x3xf32>
    %14 = arith.addf %10, %13 : vector<2x3xf32>
    %c0_12 = arith.constant 0 : index
    %c0_13 = arith.constant 0 : index
    %15 = vector.load %arg4[%c0_12, %c0_13] : memref<1x3xf32, #tpu.memory_space<vmem>>, vector<1x3xf32>
    %16 = vector.broadcast %15 : vector<1x3xf32> to vector<2x3xf32>
    %17 = arith.addf %14, %16 : vector<2x3xf32>
    %c0_14 = arith.constant 0 : index
    %c0_15 = arith.constant 0 : index
    %18 = vector.load %arg5[%c0_14, %c0_15] : memref<2x3xf32, #tpu.memory_space<vmem>>, vector<2x3xf32>
    tpu.vector_store %arg5[%c0_14, %c0_15], %17 {strides = array<i32>} : memref<2x3xf32, #tpu.memory_space<vmem>>, vector<2x3xf32>,
    return
  }
  func.func @transform_0(%arg0: i32) -> (i32, i32) {
    %c0_i32 = arith.constant 0 : i32
    %c0_i32_0 = arith.constant 0 : i32
    return %arg0, %c0_i32 : i32, i32
  }
  func.func @transform_1(%arg0: i32) -> (i32, i32) {
    %c0_i32 = arith.constant 0 : i32
    %c0_i32_0 = arith.constant 0 : i32
    return %arg0, %c0_i32 : i32, i32
  }
  func.func @transform_2(%arg0: i32) -> (i32, i32, i32) {
    %c0_i32 = arith.constant 0 : i32
    %c0_i32_0 = arith.constant 0 : i32
    %c0_i32_1 = arith.constant 0 : i32
    %c0_i32_2 = arith.constant 0 : i32
    return %c0_i32, %c0_i32_0, %c0_i32_1 : i32, i32, i32
  }
  func.func @transform_3(%arg0: i32) -> (i32, i32) {
    %c0_i32 = arith.constant 0 : i32
    %c0_i32_0 = arith.constant 0 : i32
    %c0_i32_1 = arith.constant 0 : i32
    return %c0_i32, %c0_i32_0 : i32, i32
  }
  func.func @transform_4(%arg0: i32) -> (i32, i32) {
    %c0_i32 = arith.constant 0 : i32
    %c0_i32_0 = arith.constant 0 : i32
    return %arg0, %c0_i32 : i32, i32
  }
}

</mosaic_0001>

<bundles_post_ra>
// kernel: tpu_custom_call.1
= control target key start
LH: loop header
LB: loop body
LE: loop exit
PB: predicated region body
PF: predicated region fallthrough
CT: control target
= control target key end

     0   :  { %vm31_vm0 = vcmask 261120   ;;  %s243_s0 = inlined_call_operand.vmem [shape: f32[2,32], index: 0, kind: input, shape index: {}]   ;;  %s244_s1 = inlined_call_operand.vmem [shape: f32[2,32], index: 1, kind: input, shape index: {}]   ;;  %s245_s2 = inlined_call_operand.vmem [shape: f32[3,32,3], index: 2, kind: input, shape index: {}]   ;;  %s246_s3 = inlined_call_operand.vmem [shape: f32[1,3], index: 3, kind: input, shape index: {}]   ;;  %s247_s4 = inlined_call_operand.hbm [shape: f32[2,3], index: 4, kind: output, shape index: {}]  }
   0x1   :  { %v139_v0 = vld [vmem:[%s245_s2 + $0x58] sm:$0xff]  ;;  %v138_v1 = vld [vmem:[%s245_s2 + $0x50] sm:$0xff]  ;;  %v137_v5 = vld [vmem:[%s245_s2 + $0x48] sm:$0xff] }
   0x2   :  { %v133_v2 = vld [vmem:[%s245_s2 + $0x38] sm:$0xff]  ;;  %98 = vmatpush.msra.mxu2 %v139_v0  ;;  %v132_v4 = vld [vmem:[%s245_s2 + $0x30] sm:$0xff]  ;;  %v18_v7 = vld [vmem:[%s243_s0] sm:$0x3] }
   0x3   :  { %47 = vmatpush.msra.mxu0 %v133_v2  ;;  %v25_v3 = vld [vmem:[%s245_s2 + $0x18] sm:$0xff]  ;;  %v24_v6 = vld [vmem:[%s245_s2 + $0x10] sm:$0xff]  ;;  %v19_v8 = vld [vmem:[%s244_s1] sm:$0x3] }
   0x4   :  { %70 = vmatpush.msra.mxu1 %v25_v3  ;;  %99 = vmatpush.msra.mxu2 %v138_v1  ;;  %v131_v9 = vld [vmem:[%s245_s2 + $0x28] sm:$0xff]  ;;  %v136_v11 = vld [vmem:[%s245_s2 + $0x40] sm:$0xff]  ;;  %v20_v12 = vsub.f32 %v18_v7, %v19_v8 }
   0x5   :  { %48 = vmatpush.msra.mxu0 %v132_v4  ;;  %v23_v10 = vld [vmem:[%s245_s2 + $0x8] sm:$0xff]  ;;  %v130_v13 = vld [vmem:[%s245_s2 + $0x20] sm:$0xff] }
   0x6   :  { %71 = vmatpush.msra.mxu1 %v24_v6  ;;  %100 = vmatpush.msra.mxu2 %v137_v5  ;;  %v22_v14 = vld [vmem:[%s245_s2] sm:$0xff] }
   0x7   :  { %49 = vmatpush.msra.mxu0 %v131_v9 }
   0x8   :  { %9 = vsyncpa [#allocation3], 0  ;;  %v21_v15 = vand.u32 2147483647, %v20_v12  ;;  %72 = vmatpush.msra.mxu1 %v23_v10  ;;  %101 = vmatpush.msra.mxu2 %v136_v11  ;;  %v142_v19 = vld [vmem:[%s246_s3] ss:$0 sm:$0xff] }
   0x9   :  { %50 = vmatpush.msra.mxu0 %v130_v13  ;;  %s169_s17 = smov [#allocation2]   ;;  %s121_s20 = sshll.u32 %s247_s4, 4  ;;  %vm112_vm1 = vcmask 17408   ;;  %s122_s20 = int_to_ptr.hbm [resolvable:$true] %s121_s20 }
   0xa   :  { %140 = vmatmul.msk.f32.vlgmr.msra.gmra.mxu2 %vm31_vm0, %v21_v15  ;;  %73 = vmatpush.msra.mxu1 %v22_v14  ;;  %s119_s18 = sshll.u32 %s169_s17, 4  ;;  %s120_s18 = int_to_ptr.vmem [resolvable:$true] %s119_s18 }
   0xb   :  { %134 = vmatmul.msk.f32.vlgmr.msra.gmra.mxu0 %vm31_vm0, %v19_v8  ;;  %135 = vmatmul.msk.f32.vlgmr.msra.gmra.mxu1 %vm31_vm0, %v18_v7 }
  0x88   :  { %v52_v16 = vpop.f32.mrf.mxu0  ;;  %v75_v17 = vpop.f32.mrf.mxu1 }
  0x89   :  { %v76_v18 = vadd.f32 %v75_v17, %v52_v16 }
  0x8d   :  { %v103_v20 = vpop.f32.mrf.mxu2 }
  0x8e   :  { %v106_v21 = vadd.f32 %v103_v20, %v76_v18 }
  0x90   :  { %v111_v22 = vadd.f32 %v142_v19, %v106_v21 }
  0x92   :  { %113 = vst.msk [vmem:[#allocation2] sm:$0x3] %vm112_vm1, %v111_v22 }
  0x93   :  { %124 = dma.vmem_to_hbm [thread:$0]  %s120_s18, 32, %s122_s20, [#allocation3]  }
  0x94   :  { %167 = dma.done.wait [#allocation3], 32  }
  0x95   :  { %168 = vsyncadd [#allocation3], 4294967264 }
  0x96   :  { %129 = vsyncpa [#allocation3], 1 }

</bundles_post_ra>
